<compile_context>
chip_gen: v6e
topology: v6e:2x2x1
jax: 0.10.0
libtpu: 0.0.40
codegen_flags: <defaults>
</compile_context>

<pallas_src>
import jax
import jax.numpy as jnp
from jax import lax
from jax.experimental import pallas as pl
from jax.experimental.pallas import tpu as pltpu


# --------------------------------------------------------------------------
# Pallas kernel
# --------------------------------------------------------------------------
def _make_residual_block_kernel(L, k, d, block_b, apply_relu2, has_conv3):
    """Kernel body for a fixed (static) configuration."""
    P = d * (k - 1)                    # causal left padding
    Q = -(-2 * P // 128) * 128         # pad width rounded up to a lane tile (aligned concat)
    Lq = L + P                         # conv1 evaluated over the left-padded range

    def kernel(x_ref, w1_ref, b1_ref, w2_ref, b2_ref, *rest):
        # x_ref : (block_b, Cin, L)   batch tile, channels on sublanes, L on lanes
        # w1_ref: (k, F1, Cin)        conv1 weights, tap-major
        # b1_ref: (F1, 1)
        # w2_ref: (k, Cout, F1)
        # b2_ref: (Cout, 1)
        # [w3_ref: (Cout, Cin), b3_ref: (Cout, 1)]   only when has_conv3
        # o_ref : (block_b, Cout, L)
        if has_conv3:
            w3_ref, b3_ref, o_ref = rest
        else:
            (o_ref,) = rest

        F1 = w1_ref.shape[1]
        Cin = x_ref.shape[1]
        cdt = x_ref.dtype              # MXU input dtype (f32 or bf16)

        # Hoist the tiny weights / biases / constants out of the batch loop.
        w1 = [w1_ref[t] for t in range(k)]
        w2 = [w2_ref[t] for t in range(k)]
        b1 = b1_ref[...].astype(jnp.float32)
        b2 = b2_ref[...].astype(jnp.float32)
        if has_conv3:
            w3 = w3_ref[...]
            b3 = b3_ref[...].astype(jnp.float32)
        if P > 0:
            zpad = jnp.zeros((Cin, Q), cdt)
            lane = lax.broadcasted_iota(jnp.int32, (F1, Lq), 1)
            pad_mask = lane >= P       # first P positions are the causal zero pad

        for b in range(block_b):       # static unroll over the batch tile
            x_b = x_ref[b]                                        # (Cin, L)
            # Causal zero padding as a lane-tile-aligned concat (no VMEM scratch).
            xq = x_b if P == 0 else jnp.concatenate([zpad, x_b], axis=1)  # (Cin, Q+L)

            # ---- conv1 (causal dilated conv as k accumulating MXU dots) ----
            # Evaluated over [0, L+P) so that, after masking the first P lanes,
            # the result is already the left-padded input of conv2.
            a0 = Q - 2 * P
            acc1 = jnp.dot(w1[0], xq[:, a0:a0 + Lq],
                           preferred_element_type=jnp.float32)
            for t in range(1, k):
                acc1 = acc1 + jnp.dot(w1[t], xq[:, a0 + t * d:a0 + t * d + Lq],
                                      preferred_element_type=jnp.float32)
            h = jnp.maximum(acc1 + b1, 0.0)        # ReLU; dropout = identity (eval)
            if P > 0:
                h = jnp.where(pad_mask, h, 0.0)    # exact zeros in the causal pad
            h = h.astype(cdt)                      # bf16 MXU inputs when cdt==bf16

            # ---- conv2 (reads shifted value slices of the padded hidden) ----
            acc2 = jnp.dot(w2[0], h[:, 0:L], preferred_element_type=jnp.float32)
            for t in range(1, k):
                acc2 = acc2 + jnp.dot(w2[t], h[:, t * d:t * d + L],
                                      preferred_element_type=jnp.float32)
            y = acc2 + b2
            if apply_relu2:                        # nr_blocks_below < num_layers - 1
                y = jnp.maximum(y, 0.0)
            # dropout = identity (eval)

            # ---- residual path ----
            if has_conv3:                          # conv1.in_channels != conv2.out_channels
                res = jnp.dot(w3, x_b, preferred_element_type=jnp.float32) + b3
            else:
                res = x_b.astype(jnp.float32)

            o_ref[b] = (y + res).astype(o_ref.dtype)

    return kernel


# --------------------------------------------------------------------------
# Wrapper: NCL-native, batch-tiled parallel grid, conditional conv3 operands
# --------------------------------------------------------------------------
def residual_block_pallas(x_ncl, params, *, kernel_size, dilation,
                          apply_relu2, has_conv3, block_b=None):
    B, Cin, L = x_ncl.shape
    F1 = params["w1"].shape[0]
    Cout = params["w2"].shape[0]
    dt = x_ncl.dtype

    # Weights: PyTorch (Cout, Cin, k) -> tap-major (k, Cout, Cin); biases -> (C, 1).
    w1 = jnp.transpose(params["w1"], (2, 0, 1)).astype(dt)
    b1 = params["b1"].reshape(F1, 1).astype(dt)
    w2 = jnp.transpose(params["w2"], (2, 0, 1)).astype(dt)
    b2 = params["b2"].reshape(Cout, 1).astype(dt)

    # Batch-tile size: amortize per-grid-step overhead while keeping the
    # double-buffered in/out blocks well within VMEM (v7x: 64 MiB physical).
    if block_b is None:
        block_b = min(B, 8)
    per_elem = 2 * L * (Cin + Cout) * jnp.dtype(dt).itemsize
    budget = 8 * 1024 * 1024
    block_b = int(max(1, min(block_b, B, budget // max(per_elem, 1))))
    grid = (pl.cdiv(B, block_b),)

    in_specs = [
        pl.BlockSpec((block_b, Cin, L), lambda i: (i, 0, 0)),
        pl.BlockSpec((kernel_size, F1, Cin), lambda i: (0, 0, 0)),
        pl.BlockSpec((F1, 1), lambda i: (0, 0)),
        pl.BlockSpec((kernel_size, Cout, F1), lambda i: (0, 0, 0)),
        pl.BlockSpec((Cout, 1), lambda i: (0, 0)),
    ]
    args = [x_ncl, w1, b1, w2, b2]
    if has_conv3:
        w3 = params["w3"][:, :, 0].astype(dt)          # (Cout, Cin)
        b3 = params["b3"].reshape(Cout, 1).astype(dt)
        in_specs += [pl.BlockSpec((Cout, Cin), lambda i: (0, 0)),
                     pl.BlockSpec((Cout, 1), lambda i: (0, 0))]
        args += [w3, b3]

    kernel = _make_residual_block_kernel(L, kernel_size, dilation, block_b,
                                         apply_relu2, has_conv3)

    out = pl.pallas_call(
        kernel,
        out_shape=jax.ShapeDtypeStruct((B, Cout, L), dt),
        grid_spec=pltpu.PrefetchScalarGridSpec(
            num_scalar_prefetch=0,
            grid=grid,
            in_specs=in_specs,
            out_specs=pl.BlockSpec((block_b, Cout, L), lambda i: (i, 0, 0)),
        ),
        compiler_params=pltpu.CompilerParams(
            dimension_semantics=("parallel",)),
    )(*args)
    return out


# --------------------------------------------------------------------------
# Pure-JAX reference (for correctness check)
# --------------------------------------------------------------------------
def _conv1d_ref(x_ncl, w, b, dilation, left_pad):
    out = lax.conv_general_dilated(
        x_ncl, w, window_strides=(1,), padding=[(left_pad, 0)],
        rhs_dilation=(dilation,), dimension_numbers=("NCH", "OIH", "NCH"))
    return out + b[None, :, None]


def residual_block_ref(x_ncl, params, *, kernel_size, dilation,
                       apply_relu2, has_conv3):
    pad = dilation * (kernel_size - 1)
    h = jax.nn.relu(_conv1d_ref(x_ncl, params["w1"], params["b1"],
                                dilation, pad))
    y = _conv1d_ref(h, params["w2"], params["b2"], dilation, pad)
    if apply_relu2:
        y = jax.nn.relu(y)
    if has_conv3:
        res = _conv1d_ref(x_ncl, params["w3"], params["b3"], 1, 0)
    else:
        res = x_ncl
    return y + res


# --------------------------------------------------------------------------
# Deterministic parameter construction + test harness
# --------------------------------------------------------------------------
def make_params(key, in_dim, num_filters, out_dim, kernel_size, has_conv3):
    k1, k2, k3, k4, k5, k6 = jax.random.split(key, 6)
    params = {
        "w1": 0.1 * jax.random.normal(k1, (num_filters, in_dim, kernel_size),
                                      jnp.float32),
        "b1": 0.1 * jax.random.normal(k2, (num_filters,), jnp.float32),
        "w2": 0.1 * jax.random.normal(k3, (out_dim, num_filters, kernel_size),
                                      jnp.float32),
        "b2": 0.1 * jax.random.normal(k4, (out_dim,), jnp.float32),
    }
    if has_conv3:
        params["w3"] = 0.1 * jax.random.normal(k5, (out_dim, in_dim, 1),
                                               jnp.float32)
        params["b3"] = 0.1 * jax.random.normal(k6, (out_dim,), jnp.float32)
    return params


def run_config(key, *, batch, length, input_size, target_size, num_filters,
               kernel_size, dilation_base, nr_blocks_below, num_layers,
               dtype=jnp.float32, atol=1e-4, rtol=1e-4):
    in_dim = input_size if nr_blocks_below == 0 else num_filters
    out_dim = target_size if nr_blocks_below == num_layers - 1 else num_filters
    dilation = dilation_base ** nr_blocks_below
    apply_relu2 = nr_blocks_below < num_layers - 1
    has_conv3 = in_dim != out_dim

    kp, kx = jax.random.split(key)
    params = make_params(kp, in_dim, num_filters, out_dim, kernel_size,
                         has_conv3)
    x = jax.random.normal(kx, (batch, in_dim, length), jnp.float32)

    x_c = x.astype(dtype)
    params_c = {k: v.astype(dtype) for k, v in params.items()}

    out = residual_block_pallas(x_c, params_c, kernel_size=kernel_size,
                                dilation=dilation, apply_relu2=apply_relu2,
                                has_conv3=has_conv3)
    out = jax.block_until_ready(out)

    params_ref = {k: v.astype(jnp.float32) for k, v in params_c.items()}
    ref = residual_block_ref(x_c.astype(jnp.float32), params_ref,
                             kernel_size=kernel_size, dilation=dilation,
                             apply_relu2=apply_relu2, has_conv3=has_conv3)

    assert out.shape == (batch, out_dim, length), out.shape
    err = jnp.max(jnp.abs(out.astype(jnp.float32) - ref))
    assert jnp.allclose(out.astype(jnp.float32), ref, atol=atol, rtol=rtol), \
        f"max err {err}"
    return out


if __name__ == "__main__":
    key = jax.random.PRNGKey(0)
    k_a, k_b, k_c = jax.random.split(key, 3)

    # A: first block  (in=input_size=4, d=1, conv3 present, ReLU after conv2)
    run_config(k_a, batch=4, length=128, input_size=4, target_size=3,
               num_filters=8, kernel_size=3, dilation_base=2,
               nr_blocks_below=0, num_layers=3)

    # B: middle block (in=out=num_filters, d=2, no conv3, ReLU)
    #    batch=16 -> two parallel grid steps of 8 elements each.
    run_config(k_b, batch=16, length=128, input_size=4, target_size=3,
               num_filters=8, kernel_size=3, dilation_base=2,
               nr_blocks_below=1, num_layers=3)

    # C: last block   (out=target_size=3, d=2, conv3 present, no final ReLU)
    #    bf16 activations/weights with f32 MXU accumulation.
    run_config(k_c, batch=4, length=128, input_size=4, target_size=3,
               num_filters=8, kernel_size=3, dilation_base=2,
               nr_blocks_below=1, num_layers=2,
               dtype=jnp.bfloat16, atol=3e-2, rtol=3e-2)

    print("KERNEL_OK")
</pallas_src>

<mosaic_0001>
module attributes {stable_mosaic.version = 11 : i64} {
  func.func @kernel(%arg0: i32, %arg1: memref<4x4x128xf32, #tpu.memory_space<vmem>>, %arg2: memref<3x8x4xf32, #tpu.memory_space<vmem>>, %arg3: memref<8x1xf32, #tpu.memory_space<vmem>>, %arg4: memref<3x8x8xf32, #tpu.memory_space<vmem>>, %arg5: memref<8x1xf32, #tpu.memory_space<vmem>>, %arg6: memref<8x4xf32, #tpu.memory_space<vmem>>, %arg7: memref<8x1xf32, #tpu.memory_space<vmem>>, %arg8: memref<4x8x128xf32, #tpu.memory_space<vmem>>) attributes {dimension_semantics = [#tpu.dimension_semantics<parallel>], iteration_bounds = array<i64: 1>, scalar_prefetch = 0 : i64, scratch_operands = 0 : i64, tpu.core_type = #tpu.core_type<tc>, window_params = [{transform_indices = @transform_0, window_bounds = array<i64: 4, 4, 128>}, {pipeline_mode = #tpu.pipeline_mode<synchronous>, transform_indices = @transform_1, window_bounds = array<i64: 3, 8, 4>}, {pipeline_mode = #tpu.pipeline_mode<synchronous>, transform_indices = @transform_2, window_bounds = array<i64: 8, 1>}, {pipeline_mode = #tpu.pipeline_mode<synchronous>, transform_indices = @transform_3, window_bounds = array<i64: 3, 8, 8>}, {pipeline_mode = #tpu.pipeline_mode<synchronous>, transform_indices = @transform_4, window_bounds = array<i64: 8, 1>}, {pipeline_mode = #tpu.pipeline_mode<synchronous>, transform_indices = @transform_5, window_bounds = array<i64: 8, 4>}, {pipeline_mode = #tpu.pipeline_mode<synchronous>, transform_indices = @transform_6, window_bounds = array<i64: 8, 1>}, {transform_indices = @transform_7, window_bounds = array<i64: 4, 8, 128>}]} {
    %c0 = arith.constant 0 : index
    %c0_0 = arith.constant 0 : index
    %c0_1 = arith.constant 0 : index
    %0 = vector.load %arg2[%c0, %c0_0, %c0_1] : memref<3x8x4xf32, #tpu.memory_space<vmem>>, vector<1x8x4xf32>
    %1 = vector.shape_cast %0 : vector<1x8x4xf32> to vector<8x4xf32>
    %c1 = arith.constant 1 : index
    %c0_2 = arith.constant 0 : index
    %c0_3 = arith.constant 0 : index
    %2 = vector.load %arg2[%c1, %c0_2, %c0_3] : memref<3x8x4xf32, #tpu.memory_space<vmem>>, vector<1x8x4xf32>
    %3 = vector.shape_cast %2 : vector<1x8x4xf32> to vector<8x4xf32>
    %c2 = arith.constant 2 : index
    %c0_4 = arith.constant 0 : index
    %c0_5 = arith.constant 0 : index
    %4 = vector.load %arg2[%c2, %c0_4, %c0_5] : memref<3x8x4xf32, #tpu.memory_space<vmem>>, vector<1x8x4xf32>
    %5 = vector.shape_cast %4 : vector<1x8x4xf32> to vector<8x4xf32>
    %c0_6 = arith.constant 0 : index
    %c0_7 = arith.constant 0 : index
    %c0_8 = arith.constant 0 : index
    %6 = vector.load %arg4[%c0_6, %c0_7, %c0_8] : memref<3x8x8xf32, #tpu.memory_space<vmem>>, vector<1x8x8xf32>
    %7 = vector.shape_cast %6 : vector<1x8x8xf32> to vector<8x8xf32>
    %c1_9 = arith.constant 1 : index
    %c0_10 = arith.constant 0 : index
    %c0_11 = arith.constant 0 : index
    %8 = vector.load %arg4[%c1_9, %c0_10, %c0_11] : memref<3x8x8xf32, #tpu.memory_space<vmem>>, vector<1x8x8xf32>
    %9 = vector.shape_cast %8 : vector<1x8x8xf32> to vector<8x8xf32>
    %c2_12 = arith.constant 2 : index
    %c0_13 = arith.constant 0 : index
    %c0_14 = arith.constant 0 : index
    %10 = vector.load %arg4[%c2_12, %c0_13, %c0_14] : memref<3x8x8xf32, #tpu.memory_space<vmem>>, vector<1x8x8xf32>
    %11 = vector.shape_cast %10 : vector<1x8x8xf32> to vector<8x8xf32>
    %c0_15 = arith.constant 0 : index
    %c0_16 = arith.constant 0 : index
    %12 = vector.load %arg3[%c0_15, %c0_16] : memref<8x1xf32, #tpu.memory_space<vmem>>, vector<8x1xf32>
    %c0_17 = arith.constant 0 : index
    %c0_18 = arith.constant 0 : index
    %13 = vector.load %arg5[%c0_17, %c0_18] : memref<8x1xf32, #tpu.memory_space<vmem>>, vector<8x1xf32>
    %c0_19 = arith.constant 0 : index
    %c0_20 = arith.constant 0 : index
    %14 = vector.load %arg6[%c0_19, %c0_20] : memref<8x4xf32, #tpu.memory_space<vmem>>, vector<8x4xf32>
    %c0_21 = arith.constant 0 : index
    %c0_22 = arith.constant 0 : index
    %15 = vector.load %arg7[%c0_21, %c0_22] : memref<8x1xf32, #tpu.memory_space<vmem>>, vector<8x1xf32>
    %cst = arith.constant 0.000000e+00 : f32
    %16 = vector.broadcast %cst : f32 to vector<4x128xf32>
    %17 = tpu.iota {dimensions = array<i32: 1>} : vector<8x130xi32>
    %c2_i32 = arith.constant 2 : i32
    %18 = vector.broadcast %c2_i32 : i32 to vector<8x130xi32>
    %19 = arith.cmpi sge, %17, %18 : vector<8x130xi32>
    %c0_23 = arith.constant 0 : index
    %c0_24 = arith.constant 0 : index
    %c0_25 = arith.constant 0 : index
    %20 = vector.load %arg1[%c0_23, %c0_24, %c0_25] : memref<4x4x128xf32, #tpu.memory_space<vmem>>, vector<1x4x128xf32>
    %21 = vector.shape_cast %20 : vector<1x4x128xf32> to vector<4x128xf32>
    %22 = tpu.concatenate %16, %21 in 1 : vector<4x128xf32>, vector<4x128xf32> -> vector<4x256xf32>
    %23 = vector.extract_strided_slice %22 {offsets = [0, 124], sizes = [4, 130], strides = [1, 1]} : vector<4x256xf32> to vector<4x130xf32>
    %cst_26 = arith.constant dense<0.000000e+00> : vector<8x130xf32>
    %24 = tpu.matmul %1, %23, %cst_26 {dimension_numbers = #tpu.dot_dimension_numbers<[1], [0], [0], [1], [0, 0, 1, 1], [], []>} : vector<8x4xf32>, vector<4x130xf32>, vector<8x130xf32> -> vector<8x130xf32>
    %25 = vector.extract_strided_slice %22 {offsets = [0, 125], sizes = [4, 130], strides = [1, 1]} : vector<4x256xf32> to vector<4x130xf32>
    %cst_27 = arith.constant dense<0.000000e+00> : vector<8x130xf32>
    %26 = tpu.matmul %3, %25, %cst_27 {dimension_numbers = #tpu.dot_dimension_numbers<[1], [0], [0], [1], [0, 0, 1, 1], [], []>} : vector<8x4xf32>, vector<4x130xf32>, vector<8x130xf32> -> vector<8x130xf32>
    %27 = arith.addf %24, %26 : vector<8x130xf32>
    %28 = vector.extract_strided_slice %22 {offsets = [0, 126], sizes = [4, 130], strides = [1, 1]} : vector<4x256xf32> to vector<4x130xf32>
    %cst_28 = arith.constant dense<0.000000e+00> : vector<8x130xf32>
    %29 = tpu.matmul %5, %28, %cst_28 {dimension_numbers = #tpu.dot_dimension_numbers<[1], [0], [0], [1], [0, 0, 1, 1], [], []>} : vector<8x4xf32>, vector<4x130xf32>, vector<8x130xf32> -> vector<8x130xf32>
    %30 = arith.addf %27, %29 : vector<8x130xf32>
    %31 = vector.broadcast %12 : vector<8x1xf32> to vector<8x130xf32>
    %32 = arith.addf %30, %31 : vector<8x130xf32>
    %cst_29 = arith.constant 0.000000e+00 : f32
    %33 = vector.broadcast %cst_29 : f32 to vector<8x130xf32>
    %34 = arith.maximumf %32, %33 : vector<8x130xf32>
    %cst_30 = arith.constant 0.000000e+00 : f32
    %35 = vector.broadcast %cst_30 : f32 to vector<8x130xf32>
    %36 = arith.select %19, %34, %35 : vector<8x130xi1>, vector<8x130xf32>
    %37 = vector.extract_strided_slice %36 {offsets = [0, 0], sizes = [8, 128], strides = [1, 1]} : vector<8x130xf32> to vector<8x128xf32>
    %cst_31 = arith.constant dense<0.000000e+00> : vector<8x128xf32>
    %38 = tpu.matmul %7, %37, %cst_31 {dimension_numbers = #tpu.dot_dimension_numbers<[1], [0], [0], [1], [0, 0, 1, 1], [], []>} : vector<8x8xf32>, vector<8x128xf32>, vector<8x128xf32> -> vector<8x128xf32>
    %39 = vector.extract_strided_slice %36 {offsets = [0, 1], sizes = [8, 128], strides = [1, 1]} : vector<8x130xf32> to vector<8x128xf32>
    %cst_32 = arith.constant dense<0.000000e+00> : vector<8x128xf32>
    %40 = tpu.matmul %9, %39, %cst_32 {dimension_numbers = #tpu.dot_dimension_numbers<[1], [0], [0], [1], [0, 0, 1, 1], [], []>} : vector<8x8xf32>, vector<8x128xf32>, vector<8x128xf32> -> vector<8x128xf32>
    %41 = arith.addf %38, %40 : vector<8x128xf32>
    %42 = vector.extract_strided_slice %36 {offsets = [0, 2], sizes = [8, 128], strides = [1, 1]} : vector<8x130xf32> to vector<8x128xf32>
    %cst_33 = arith.constant dense<0.000000e+00> : vector<8x128xf32>
    %43 = tpu.matmul %11, %42, %cst_33 {dimension_numbers = #tpu.dot_dimension_numbers<[1], [0], [0], [1], [0, 0, 1, 1], [], []>} : vector<8x8xf32>, vector<8x128xf32>, vector<8x128xf32> -> vector<8x128xf32>
    %44 = arith.addf %41, %43 : vector<8x128xf32>
    %45 = vector.broadcast %13 : vector<8x1xf32> to vector<8x128xf32>
    %46 = arith.addf %44, %45 : vector<8x128xf32>
    %cst_34 = arith.constant 0.000000e+00 : f32
    %47 = vector.broadcast %cst_34 : f32 to vector<8x128xf32>
    %48 = arith.maximumf %46, %47 : vector<8x128xf32>
    %cst_35 = arith.constant dense<0.000000e+00> : vector<8x128xf32>
    %49 = tpu.matmul %14, %21, %cst_35 {dimension_numbers = #tpu.dot_dimension_numbers<[1], [0], [0], [1], [0, 0, 1, 1], [], []>} : vector<8x4xf32>, vector<4x128xf32>, vector<8x128xf32> -> vector<8x128xf32>
    %50 = vector.broadcast %15 : vector<8x1xf32> to vector<8x128xf32>
    %51 = arith.addf %49, %50 : vector<8x128xf32>
    %52 = arith.addf %48, %51 : vector<8x128xf32>
    %c0_36 = arith.constant 0 : index
    %c0_37 = arith.constant 0 : index
    %c0_38 = arith.constant 0 : index
    %53 = vector.load %arg8[%c0_36, %c0_37, %c0_38] : memref<4x8x128xf32, #tpu.memory_space<vmem>>, vector<1x8x128xf32>
    %54 = vector.shape_cast %53 : vector<1x8x128xf32> to vector<8x128xf32>
    %55 = vector.shape_cast %52 : vector<8x128xf32> to vector<1x8x128xf32>
    tpu.vector_store %arg8[%c0_36, %c0_37, %c0_38], %55 {strides = array<i32>} : memref<4x8x128xf32, #tpu.memory_space<vmem>>, vector<1x8x128xf32>,
    %c1_39 = arith.constant 1 : index
    %c0_40 = arith.constant 0 : index
    %c0_41 = arith.constant 0 : index
    %56 = vector.load %arg1[%c1_39, %c0_40, %c0_41] : memref<4x4x128xf32, #tpu.memory_space<vmem>>, vector<1x4x128xf32>
    %57 = vector.shape_cast %56 : vector<1x4x128xf32> to vector<4x128xf32>
    %58 = tpu.concatenate %16, %57 in 1 : vector<4x128xf32>, vector<4x128xf32> -> vector<4x256xf32>
    %59 = vector.extract_strided_slice %58 {offsets = [0, 124], sizes = [4, 130], strides = [1, 1]} : vector<4x256xf32> to vector<4x130xf32>
    %cst_42 = arith.constant dense<0.000000e+00> : vector<8x130xf32>
    %60 = tpu.matmul %1, %59, %cst_42 {dimension_numbers = #tpu.dot_dimension_numbers<[1], [0], [0], [1], [0, 0, 1, 1], [], []>} : vector<8x4xf32>, vector<4x130xf32>, vector<8x130xf32> -> vector<8x130xf32>
    %61 = vector.extract_strided_slice %58 {offsets = [0, 125], sizes = [4, 130], strides = [1, 1]} : vector<4x256xf32> to vector<4x130xf32>
    %cst_43 = arith.constant dense<0.000000e+00> : vector<8x130xf32>
    %62 = tpu.matmul %3, %61, %cst_43 {dimension_numbers = #tpu.dot_dimension_numbers<[1], [0], [0], [1], [0, 0, 1, 1], [], []>} : vector<8x4xf32>, vector<4x130xf32>, vector<8x130xf32> -> vector<8x130xf32>
    %63 = arith.addf %60, %62 : vector<8x130xf32>
    %64 = vector.extract_strided_slice %58 {offsets = [0, 126], sizes = [4, 130], strides = [1, 1]} : vector<4x256xf32> to vector<4x130xf32>
    %cst_44 = arith.constant dense<0.000000e+00> : vector<8x130xf32>
    %65 = tpu.matmul %5, %64, %cst_44 {dimension_numbers = #tpu.dot_dimension_numbers<[1], [0], [0], [1], [0, 0, 1, 1], [], []>} : vector<8x4xf32>, vector<4x130xf32>, vector<8x130xf32> -> vector<8x130xf32>
    %66 = arith.addf %63, %65 : vector<8x130xf32>
    %67 = vector.broadcast %12 : vector<8x1xf32> to vector<8x130xf32>
    %68 = arith.addf %66, %67 : vector<8x130xf32>
    %cst_45 = arith.constant 0.000000e+00 : f32
    %69 = vector.broadcast %cst_45 : f32 to vector<8x130xf32>
    %70 = arith.maximumf %68, %69 : vector<8x130xf32>
    %cst_46 = arith.constant 0.000000e+00 : f32
    %71 = vector.broadcast %cst_46 : f32 to vector<8x130xf32>
    %72 = arith.select %19, %70, %71 : vector<8x130xi1>, vector<8x130xf32>
    %73 = vector.extract_strided_slice %72 {offsets = [0, 0], sizes = [8, 128], strides = [1, 1]} : vector<8x130xf32> to vector<8x128xf32>
    %cst_47 = arith.constant dense<0.000000e+00> : vector<8x128xf32>
    %74 = tpu.matmul %7, %73, %cst_47 {dimension_numbers = #tpu.dot_dimension_numbers<[1], [0], [0], [1], [0, 0, 1, 1], [], []>} : vector<8x8xf32>, vector<8x128xf32>, vector<8x128xf32> -> vector<8x128xf32>
    %75 = vector.extract_strided_slice %72 {offsets = [0, 1], sizes = [8, 128], strides = [1, 1]} : vector<8x130xf32> to vector<8x128xf32>
    %cst_48 = arith.constant dense<0.000000e+00> : vector<8x128xf32>
    %76 = tpu.matmul %9, %75, %cst_48 {dimension_numbers = #tpu.dot_dimension_numbers<[1], [0], [0], [1], [0, 0, 1, 1], [], []>} : vector<8x8xf32>, vector<8x128xf32>, vector<8x128xf32> -> vector<8x128xf32>
    %77 = arith.addf %74, %76 : vector<8x128xf32>
    %78 = vector.extract_strided_slice %72 {offsets = [0, 2], sizes = [8, 128], strides = [1, 1]} : vector<8x130xf32> to vector<8x128xf32>
    %cst_49 = arith.constant dense<0.000000e+00> : vector<8x128xf32>
    %79 = tpu.matmul %11, %78, %cst_49 {dimension_numbers = #tpu.dot_dimension_numbers<[1], [0], [0], [1], [0, 0, 1, 1], [], []>} : vector<8x8xf32>, vector<8x128xf32>, vector<8x128xf32> -> vector<8x128xf32>
    %80 = arith.addf %77, %79 : vector<8x128xf32>
    %81 = vector.broadcast %13 : vector<8x1xf32> to vector<8x128xf32>
    %82 = arith.addf %80, %81 : vector<8x128xf32>
    %cst_50 = arith.constant 0.000000e+00 : f32
    %83 = vector.broadcast %cst_50 : f32 to vector<8x128xf32>
    %84 = arith.maximumf %82, %83 : vector<8x128xf32>
    %cst_51 = arith.constant dense<0.000000e+00> : vector<8x128xf32>
    %85 = tpu.matmul %14, %57, %cst_51 {dimension_numbers = #tpu.dot_dimension_numbers<[1], [0], [0], [1], [0, 0, 1, 1], [], []>} : vector<8x4xf32>, vector<4x128xf32>, vector<8x128xf32> -> vector<8x128xf32>
    %86 = vector.broadcast %15 : vector<8x1xf32> to vector<8x128xf32>
    %87 = arith.addf %85, %86 : vector<8x128xf32>
    %88 = arith.addf %84, %87 : vector<8x128xf32>
    %c1_52 = arith.constant 1 : index
    %c0_53 = arith.constant 0 : index
    %c0_54 = arith.constant 0 : index
    %89 = vector.load %arg8[%c1_52, %c0_53, %c0_54] : memref<4x8x128xf32, #tpu.memory_space<vmem>>, vector<1x8x128xf32>
    %90 = vector.shape_cast %89 : vector<1x8x128xf32> to vector<8x128xf32>
    %91 = vector.shape_cast %88 : vector<8x128xf32> to vector<1x8x128xf32>
    tpu.vector_store %arg8[%c1_52, %c0_53, %c0_54], %91 {strides = array<i32>} : memref<4x8x128xf32, #tpu.memory_space<vmem>>, vector<1x8x128xf32>,
    %c2_55 = arith.constant 2 : index
    %c0_56 = arith.constant 0 : index
    %c0_57 = arith.constant 0 : index
    %92 = vector.load %arg1[%c2_55, %c0_56, %c0_57] : memref<4x4x128xf32, #tpu.memory_space<vmem>>, vector<1x4x128xf32>
    %93 = vector.shape_cast %92 : vector<1x4x128xf32> to vector<4x128xf32>
    %94 = tpu.concatenate %16, %93 in 1 : vector<4x128xf32>, vector<4x128xf32> -> vector<4x256xf32>
    %95 = vector.extract_strided_slice %94 {offsets = [0, 124], sizes = [4, 130], strides = [1, 1]} : vector<4x256xf32> to vector<4x130xf32>
    %cst_58 = arith.constant dense<0.000000e+00> : vector<8x130xf32>
    %96 = tpu.matmul %1, %95, %cst_58 {dimension_numbers = #tpu.dot_dimension_numbers<[1], [0], [0], [1], [0, 0, 1, 1], [], []>} : vector<8x4xf32>, vector<4x130xf32>, vector<8x130xf32> -> vector<8x130xf32>
    %97 = vector.extract_strided_slice %94 {offsets = [0, 125], sizes = [4, 130], strides = [1, 1]} : vector<4x256xf32> to vector<4x130xf32>
    %cst_59 = arith.constant dense<0.000000e+00> : vector<8x130xf32>
    %98 = tpu.matmul %3, %97, %cst_59 {dimension_numbers = #tpu.dot_dimension_numbers<[1], [0], [0], [1], [0, 0, 1, 1], [], []>} : vector<8x4xf32>, vector<4x130xf32>, vector<8x130xf32> -> vector<8x130xf32>
    %99 = arith.addf %96, %98 : vector<8x130xf32>
    %100 = vector.extract_strided_slice %94 {offsets = [0, 126], sizes = [4, 130], strides = [1, 1]} : vector<4x256xf32> to vector<4x130xf32>
    %cst_60 = arith.constant dense<0.000000e+00> : vector<8x130xf32>
    %101 = tpu.matmul %5, %100, %cst_60 {dimension_numbers = #tpu.dot_dimension_numbers<[1], [0], [0], [1], [0, 0, 1, 1], [], []>} : vector<8x4xf32>, vector<4x130xf32>, vector<8x130xf32> -> vector<8x130xf32>
    %102 = arith.addf %99, %101 : vector<8x130xf32>
    %103 = vector.broadcast %12 : vector<8x1xf32> to vector<8x130xf32>
    %104 = arith.addf %102, %103 : vector<8x130xf32>
    %cst_61 = arith.constant 0.000000e+00 : f32
    %105 = vector.broadcast %cst_61 : f32 to vector<8x130xf32>
    %106 = arith.maximumf %104, %105 : vector<8x130xf32>
    %cst_62 = arith.constant 0.000000e+00 : f32
    %107 = vector.broadcast %cst_62 : f32 to vector<8x130xf32>
    %108 = arith.select %19, %106, %107 : vector<8x130xi1>, vector<8x130xf32>
    %109 = vector.extract_strided_slice %108 {offsets = [0, 0], sizes = [8, 128], strides = [1, 1]} : vector<8x130xf32> to vector<8x128xf32>
    %cst_63 = arith.constant dense<0.000000e+00> : vector<8x128xf32>
    %110 = tpu.matmul %7, %109, %cst_63 {dimension_numbers = #tpu.dot_dimension_numbers<[1], [0], [0], [1], [0, 0, 1, 1], [], []>} : vector<8x8xf32>, vector<8x128xf32>, vector<8x128xf32> -> vector<8x128xf32>
    %111 = vector.extract_strided_slice %108 {offsets = [0, 1], sizes = [8, 128], strides = [1, 1]} : vector<8x130xf32> to vector<8x128xf32>
    %cst_64 = arith.constant dense<0.000000e+00> : vector<8x128xf32>
    %112 = tpu.matmul %9, %111, %cst_64 {dimension_numbers = #tpu.dot_dimension_numbers<[1], [0], [0], [1], [0, 0, 1, 1], [], []>} : vector<8x8xf32>, vector<8x128xf32>, vector<8x128xf32> -> vector<8x128xf32>
    %113 = arith.addf %110, %112 : vector<8x128xf32>
    %114 = vector.extract_strided_slice %108 {offsets = [0, 2], sizes = [8, 128], strides = [1, 1]} : vector<8x130xf32> to vector<8x128xf32>
    %cst_65 = arith.constant dense<0.000000e+00> : vector<8x128xf32>
    %115 = tpu.matmul %11, %114, %cst_65 {dimension_numbers = #tpu.dot_dimension_numbers<[1], [0], [0], [1], [0, 0, 1, 1], [], []>} : vector<8x8xf32>, vector<8x128xf32>, vector<8x128xf32> -> vector<8x128xf32>
    %116 = arith.addf %113, %115 : vector<8x128xf32>
    %117 = vector.broadcast %13 : vector<8x1xf32> to vector<8x128xf32>
    %118 = arith.addf %116, %117 : vector<8x128xf32>
    %cst_66 = arith.constant 0.000000e+00 : f32
    %119 = vector.broadcast %cst_66 : f32 to vector<8x128xf32>
    %120 = arith.maximumf %118, %119 : vector<8x128xf32>
    %cst_67 = arith.constant dense<0.000000e+00> : vector<8x128xf32>
    %121 = tpu.matmul %14, %93, %cst_67 {dimension_numbers = #tpu.dot_dimension_numbers<[1], [0], [0], [1], [0, 0, 1, 1], [], []>} : vector<8x4xf32>, vector<4x128xf32>, vector<8x128xf32> -> vector<8x128xf32>
    %122 = vector.broadcast %15 : vector<8x1xf32> to vector<8x128xf32>
    %123 = arith.addf %121, %122 : vector<8x128xf32>
    %124 = arith.addf %120, %123 : vector<8x128xf32>
    %c2_68 = arith.constant 2 : index
    %c0_69 = arith.constant 0 : index
    %c0_70 = arith.constant 0 : index
    %125 = vector.load %arg8[%c2_68, %c0_69, %c0_70] : memref<4x8x128xf32, #tpu.memory_space<vmem>>, vector<1x8x128xf32>
    %126 = vector.shape_cast %125 : vector<1x8x128xf32> to vector<8x128xf32>
    %127 = vector.shape_cast %124 : vector<8x128xf32> to vector<1x8x128xf32>
    tpu.vector_store %arg8[%c2_68, %c0_69, %c0_70], %127 {strides = array<i32>} : memref<4x8x128xf32, #tpu.memory_space<vmem>>, vector<1x8x128xf32>,
    %c3 = arith.constant 3 : index
    %c0_71 = arith.constant 0 : index
    %c0_72 = arith.constant 0 : index
    %128 = vector.load %arg1[%c3, %c0_71, %c0_72] : memref<4x4x128xf32, #tpu.memory_space<vmem>>, vector<1x4x128xf32>
    %129 = vector.shape_cast %128 : vector<1x4x128xf32> to vector<4x128xf32>
    %130 = tpu.concatenate %16, %129 in 1 : vector<4x128xf32>, vector<4x128xf32> -> vector<4x256xf32>
    %131 = vector.extract_strided_slice %130 {offsets = [0, 124], sizes = [4, 130], strides = [1, 1]} : vector<4x256xf32> to vector<4x130xf32>
    %cst_73 = arith.constant dense<0.000000e+00> : vector<8x130xf32>
    %132 = tpu.matmul %1, %131, %cst_73 {dimension_numbers = #tpu.dot_dimension_numbers<[1], [0], [0], [1], [0, 0, 1, 1], [], []>} : vector<8x4xf32>, vector<4x130xf32>, vector<8x130xf32> -> vector<8x130xf32>
    %133 = vector.extract_strided_slice %130 {offsets = [0, 125], sizes = [4, 130], strides = [1, 1]} : vector<4x256xf32> to vector<4x130xf32>
    %cst_74 = arith.constant dense<0.000000e+00> : vector<8x130xf32>
    %134 = tpu.matmul %3, %133, %cst_74 {dimension_numbers = #tpu.dot_dimension_numbers<[1], [0], [0], [1], [0, 0, 1, 1], [], []>} : vector<8x4xf32>, vector<4x130xf32>, vector<8x130xf32> -> vector<8x130xf32>
    %135 = arith.addf %132, %134 : vector<8x130xf32>
    %136 = vector.extract_strided_slice %130 {offsets = [0, 126], sizes = [4, 130], strides = [1, 1]} : vector<4x256xf32> to vector<4x130xf32>
    %cst_75 = arith.constant dense<0.000000e+00> : vector<8x130xf32>
    %137 = tpu.matmul %5, %136, %cst_75 {dimension_numbers = #tpu.dot_dimension_numbers<[1], [0], [0], [1], [0, 0, 1, 1], [], []>} : vector<8x4xf32>, vector<4x130xf32>, vector<8x130xf32> -> vector<8x130xf32>
    %138 = arith.addf %135, %137 : vector<8x130xf32>
    %139 = vector.broadcast %12 : vector<8x1xf32> to vector<8x130xf32>
    %140 = arith.addf %138, %139 : vector<8x130xf32>
    %cst_76 = arith.constant 0.000000e+00 : f32
    %141 = vector.broadcast %cst_76 : f32 to vector<8x130xf32>
    %142 = arith.maximumf %140, %141 : vector<8x130xf32>
    %cst_77 = arith.constant 0.000000e+00 : f32
    %143 = vector.broadcast %cst_77 : f32 to vector<8x130xf32>
    %144 = arith.select %19, %142, %143 : vector<8x130xi1>, vector<8x130xf32>
    %145 = vector.extract_strided_slice %144 {offsets = [0, 0], sizes = [8, 128], strides = [1, 1]} : vector<8x130xf32> to vector<8x128xf32>
    %cst_78 = arith.constant dense<0.000000e+00> : vector<8x128xf32>
    %146 = tpu.matmul %7, %145, %cst_78 {dimension_numbers = #tpu.dot_dimension_numbers<[1], [0], [0], [1], [0, 0, 1, 1], [], []>} : vector<8x8xf32>, vector<8x128xf32>, vector<8x128xf32> -> vector<8x128xf32>
    %147 = vector.extract_strided_slice %144 {offsets = [0, 1], sizes = [8, 128], strides = [1, 1]} : vector<8x130xf32> to vector<8x128xf32>
    %cst_79 = arith.constant dense<0.000000e+00> : vector<8x128xf32>
    %148 = tpu.matmul %9, %147, %cst_79 {dimension_numbers = #tpu.dot_dimension_numbers<[1], [0], [0], [1], [0, 0, 1, 1], [], []>} : vector<8x8xf32>, vector<8x128xf32>, vector<8x128xf32> -> vector<8x128xf32>
    %149 = arith.addf %146, %148 : vector<8x128xf32>
    %150 = vector.extract_strided_slice %144 {offsets = [0, 2], sizes = [8, 128], strides = [1, 1]} : vector<8x130xf32> to vector<8x128xf32>
    %cst_80 = arith.constant dense<0.000000e+00> : vector<8x128xf32>
    %151 = tpu.matmul %11, %150, %cst_80 {dimension_numbers = #tpu.dot_dimension_numbers<[1], [0], [0], [1], [0, 0, 1, 1], [], []>} : vector<8x8xf32>, vector<8x128xf32>, vector<8x128xf32> -> vector<8x128xf32>
    %152 = arith.addf %149, %151 : vector<8x128xf32>
    %153 = vector.broadcast %13 : vector<8x1xf32> to vector<8x128xf32>
    %154 = arith.addf %152, %153 : vector<8x128xf32>
    %cst_81 = arith.constant 0.000000e+00 : f32
    %155 = vector.broadcast %cst_81 : f32 to vector<8x128xf32>
    %156 = arith.maximumf %154, %155 : vector<8x128xf32>
    %cst_82 = arith.constant dense<0.000000e+00> : vector<8x128xf32>
    %157 = tpu.matmul %14, %129, %cst_82 {dimension_numbers = #tpu.dot_dimension_numbers<[1], [0], [0], [1], [0, 0, 1, 1], [], []>} : vector<8x4xf32>, vector<4x128xf32>, vector<8x128xf32> -> vector<8x128xf32>
    %158 = vector.broadcast %15 : vector<8x1xf32> to vector<8x128xf32>
    %159 = arith.addf %157, %158 : vector<8x128xf32>
    %160 = arith.addf %156, %159 : vector<8x128xf32>
    %c3_83 = arith.constant 3 : index
    %c0_84 = arith.constant 0 : index
    %c0_85 = arith.constant 0 : index
    %161 = vector.load %arg8[%c3_83, %c0_84, %c0_85] : memref<4x8x128xf32, #tpu.memory_space<vmem>>, vector<1x8x128xf32>
    %162 = vector.shape_cast %161 : vector<1x8x128xf32> to vector<8x128xf32>
    %163 = vector.shape_cast %160 : vector<8x128xf32> to vector<1x8x128xf32>
    tpu.vector_store %arg8[%c3_83, %c0_84, %c0_85], %163 {strides = array<i32>} : memref<4x8x128xf32, #tpu.memory_space<vmem>>, vector<1x8x128xf32>,
    return
  }
  func.func @transform_0(%arg0: i32) -> (i32, i32, i32) {
    %c0_i32 = arith.constant 0 : i32
    %c0_i32_0 = arith.constant 0 : i32
    %c0_i32_1 = arith.constant 0 : i32
    return %arg0, %c0_i32, %c0_i32_0 : i32, i32, i32
  }
  func.func @transform_1(%arg0: i32) -> (i32, i32, i32) {
    %c0_i32 = arith.constant 0 : i32
    %c0_i32_0 = arith.constant 0 : i32
    %c0_i32_1 = arith.constant 0 : i32
    %c0_i32_2 = arith.constant 0 : i32
    return %c0_i32, %c0_i32_0, %c0_i32_1 : i32, i32, i32
  }
  func.func @transform_2(%arg0: i32) -> (i32, i32) {
    %c0_i32 = arith.constant 0 : i32
    %c0_i32_0 = arith.constant 0 : i32
    %c0_i32_1 = arith.constant 0 : i32
    return %c0_i32, %c0_i32_0 : i32, i32
  }
  func.func @transform_3(%arg0: i32) -> (i32, i32, i32) {
    %c0_i32 = arith.constant 0 : i32
    %c0_i32_0 = arith.constant 0 : i32
    %c0_i32_1 = arith.constant 0 : i32
    %c0_i32_2 = arith.constant 0 : i32
    return %c0_i32, %c0_i32_0, %c0_i32_1 : i32, i32, i32
  }
  func.func @transform_4(%arg0: i32) -> (i32, i32) {
    %c0_i32 = arith.constant 0 : i32
    %c0_i32_0 = arith.constant 0 : i32
    %c0_i32_1 = arith.constant 0 : i32
    return %c0_i32, %c0_i32_0 : i32, i32
  }
  func.func @transform_5(%arg0: i32) -> (i32, i32) {
    %c0_i32 = arith.constant 0 : i32
    %c0_i32_0 = arith.constant 0 : i32
    %c0_i32_1 = arith.constant 0 : i32
    return %c0_i32, %c0_i32_0 : i32, i32
  }
  func.func @transform_6(%arg0: i32) -> (i32, i32) {
    %c0_i32 = arith.constant 0 : i32
    %c0_i32_0 = arith.constant 0 : i32
    %c0_i32_1 = arith.constant 0 : i32
    return %c0_i32, %c0_i32_0 : i32, i32
  }
  func.func @transform_7(%arg0: i32) -> (i32, i32, i32) {
    %c0_i32 = arith.constant 0 : i32
    %c0_i32_0 = arith.constant 0 : i32
    %c0_i32_1 = arith.constant 0 : i32
    return %arg0, %c0_i32, %c0_i32_0 : i32, i32, i32
  }
}

</mosaic_0001>

<bundles_post_ra>
// kernel: tpu_custom_call.1
= control target key start
LH: loop header
LB: loop body
LE: loop exit
PB: predicated region body
PF: predicated region fallthrough
CT: control target
= control target key end

     0   :  { %v2512_v0 = vmov 0.0   ;;  %s2513_s24 = smov 4   ;;  %s2514_s25 = smov 3   ;;  %s2903_s0 = inlined_call_operand.vmem [shape: f32[4,4,128], index: 0, kind: input, shape index: {}]   ;;  %s2904_s1 = inlined_call_operand.vmem [shape: f32[3,8,4], index: 1, kind: input, shape index: {}]   ;;  %s2905_s2 = inlined_call_operand.vmem [shape: f32[8,1], index: 2, kind: input, shape index: {}]   ;;  %s2906_s3 = inlined_call_operand.vmem [shape: f32[3,8,8], index: 3, kind: input, shape index: {}]   ;;  %s2907_s4 = inlined_call_operand.vmem [shape: f32[8,1], index: 4, kind: input, shape index: {}]   ;;  %s2908_s5 = inlined_call_operand.vmem [shape: f32[8,4], index: 5, kind: input, shape index: {}]   ;;  %s2909_s6 = inlined_call_operand.vmem [shape: f32[8,1], index: 6, kind: input, shape index: {}]   ;;  %s2910_s7 = inlined_call_operand.hbm [shape: f32[4,8,128], index: 7, kind: output, shape index: {}]  }
   0x1   :  { %135 = vrot.lane.b32.xlu1 %v2512_v0, %s2513_s24  ;;  %49 = vrot.lane.b32.xlu0 %v2512_v0, %s2514_s25  ;;  %v2570_v1 = vld [vmem:[%s2903_s0] sm:$0xf] }
   0x2   :  { %128 = vmatprep.mubr.f32.mxu0 %v2512_v0  ;;  %211 = vmatprep.mubr.f32.mxu1 %v2512_v0 }
   0x3   :  { %12 = vsyncpa [#allocation3], 0  ;;  %v2515_v2 = vmov 0   ;;  %s2516_s28 = smov 2   ;;  %v37_v3 = vld [vmem:[%s2905_s2] sm:$0xff]  ;;  %vm59_vm0 = vcmask 1043456   ;;  %v41_v18 = vlaneseq }
   0x4   :  { %2488 = vset.pattern.permute.xlu0 %v2515_v2  ;;  %2489 = vset.pattern.permute.xlu1 %v2515_v2  ;;  %vm53_vm1 = vcmask 23552   ;;  %vm55_vm2 = vcmask 31744   ;;  %v2592_v8 = vld [vmem:[%s2904_s1 + $0x8] sm:$0xff]  ;;  %v2597_v9 = vld [vmem:[%s2904_s1] sm:$0xff]  ;;  %vm222_vm3 = vcmask 15360   ;;  %v2617_v14 = vld [vmem:[%s2904_s1 + $0x10] sm:$0xff] }
   0x5   :  { %137 = vrot.lane.b32.xlu1 %v2570_v1, %s2513_s24  ;;  %51 = vrot.lane.b32.xlu0 %v2570_v1, %s2514_s25  ;;  %v2629_v24 = vand.u32 127, %v41_v18  ;;  %vm2517_vm4 = vmmov 0   ;;  %vm324_vm6 = vcmask 64512   ;;  %v2641_v32 = vld [vmem:[%s2906_s3] sm:$0xff]  ;;  %s2518_s14 = smov 126   ;;  %s2519_s15 = smov 127  }
   0x6   :  { %v2652_v34 = vld [vmem:[%s2903_s0 + $0x4] sm:$0xf]  ;;  %vm321_vm7 = vcmask 1039360   ;;  %v2680_v40 = vld [vmem:[%s2906_s3 + $0x8] sm:$0xff]  ;;  %vm475_vm8 = vcmask 1031168   ;;  %v2691_v44 = vld [vmem:[%s2906_s3 + $0x10] sm:$0xff] }
   0x7   :  { %vm44_vm5 = vcmp.ge.s32.totalorder %v2629_v24, 2  ;;  %v2664_v36 = vld [vmem:[%s2908_s5] sm:$0xff] }
   0x8   :  { %v40_v24 = vld [vmem:[%s2909_s6] sm:$0xff] }
   0x9   :  { %220 = vrot.lane.b32.xlu1 %v2570_v1, %s2516_s28  ;;  %218 = vrot.lane.b32.xlu0 %v2512_v0, %s2516_s28 }
   0xd   :  { %306 = vperm.xlu0 %2488, %v37_v3  }
  0x73   :  { %v2585_v4 = vpop.permute.xlu1 %135  ;;  %v2587_v5 = vpop.permute.xlu0 %49 }
  0x77   :  { %v138_v6 = vpop.permute.xlu1 %137  ;;  %v52_v7 = vpop.permute.xlu0 %51 }
  0x78   :  { %2302 = vmatprep.subr.msk.mxu0 %vm59_vm0, %v52_v7  ;;  %2305 = vmatprep.subr.msk.mxu1 %vm59_vm0, %v138_v6  ;;  %v54_v10 = vsel %vm53_vm1, %v2587_v5, %v52_v7  ;;  %v139_v11 = vsel %vm55_vm2, %v2585_v4, %v138_v6 }
  0x79   :  { %2303 = vmatpush1.msk.msra.mxu0 %vm59_vm0, %v54_v10  ;;  %2306 = vmatpush1.msk.msra.mxu1 %vm59_vm0, %v139_v11 }
  0x7a   :  { %2304 = vmatmul.mubr.msk.f32.vlgmr.msra.gmra.mxu0 %vm55_vm2, %v2592_v8  ;;  %2307 = vmatmul.mubr.msk.f32.vlgmr.msra.gmra.mxu1 %vm55_vm2, %v2597_v9 }
  0x7b   :  { %v221_v12 = vpop.permute.xlu1 %220  ;;  %v2611_v13 = vpop.permute.xlu0 %218  ;;  %295 = vmatprep.mubr.f32.mxu0 %v2512_v0  ;;  %2397 = vmatprep.subr.mxu1 %v2512_v0 }
  0x7c   :  { %2308 = vmatprep.subr.msk.mxu0 %vm59_vm0, %v221_v12  ;;  %v223_v15 = vsel %vm222_vm3, %v2611_v13, %v221_v12  ;;  %2399 = vmatprep.mubr.msk.f32.mxu1 %vm2517_vm4, %v2512_v0 }
  0x7d   :  { %2309 = vmatpush1.msk.msra.mxu0 %vm59_vm0, %v223_v15 }
  0x7e   :  { %2310 = vmatmul.mubr.msk.f32.vlgmr.msra.gmra.mxu0 %vm55_vm2, %v2617_v14  ;;  %2402 = vmatprep.subr.mxu0 %v2512_v0 }
  0x7f   :  { %2404 = vmatprep.mubr.msk.f32.mxu0 %vm2517_vm4, %v2512_v0 }
  0x88   :  { %v2627_v23 = vpop.permute.xlu0 %306 }
 0x13a   :  { %v130_v16 = vpop.f32.mrf.mxu0  ;;  %v213_v17 = vpop.f32.mrf.mxu1 }
 0x13b   :  { %v214_v21 = vadd.f32 %v213_v17, %v130_v16 }
 0x13c   :  { %v132_v19 = vpop.f32.mrf.mxu0  ;;  %v215_v20 = vpop.f32.mrf.mxu1 }
 0x13d   :  { %v216_v25 = vadd.f32 %v215_v20, %v132_v19  ;;  %v2748_v19 = vld [vmem:[%s2903_s0 + $0x8] sm:$0xf] }
 0x13e   :  { %v297_v22 = vpop.f32.mrf.mxu0 }
 0x13f   :  { %v302_v26 = vadd.f32 %v297_v22, %v214_v21 }
 0x140   :  { %v299_v27 = vpop.f32.mrf.mxu0 }
 0x141   :  { %v303_v28 = vadd.f32 %v299_v27, %v216_v25  ;;  %v309_v29 = vadd.f32 %v2627_v23, %v302_v26 }
 0x143   :  { %v311_v30 = vmax.f32 %v309_v29, 0.0  ;;  %v310_v31 = vadd.f32 %v2627_v23, %v303_v28 }
 0x145   :  { %2403 = vmatpush3.msk.msra.mxu0 %vm44_vm5, %v311_v30  ;;  %v313_v33 = vsel %vm44_vm5, %v311_v30, 0.0  ;;  %v312_v35 = vmax.f32 %v310_v31, 0.0 }
 0x146   :  { %471 = vrot.lane.b32.xlu0 %v313_v33, %s2518_s14  ;;  %317 = vrot.lane.b32.xlu1 %v313_v33, %s2519_s15 }
 0x147   :  { %2405 = vmatmul.mubr.msk.f32.vlgmr.msra.gmra.mxu0 %vm324_vm6, %v2641_v32  ;;  %2412 = vmatprep.subr.mxu0 %v2512_v0 }
 0x148   :  { %2413 = vmatpush3.msk.msra.mxu0 %vm59_vm0, %v2570_v1  ;;  %2414 = vmatprep.mubr.msk.f32.mxu0 %vm2517_vm4, %v2512_v0 }
 0x14a   :  { %644 = vrot.lane.b32.xlu0 %v2652_v34, %s2514_s25  ;;  %319 = vrot.lane.b32.xlu1 %v312_v35, %s2519_s15 }
 0x14b   :  { %2415 = vmatmul.mubr.msk.f32.vlgmr.msra.gmra.mxu0 %vm55_vm2, %v2664_v36 }
 0x14c   :  { %793 = vmatprep.mubr.f32.mxu0 %v2512_v0 }
 0x14e   :  { %800 = vrot.lane.b32.xlu0 %v2652_v34, %s2516_s28  ;;  %473 = vrot.lane.b32.xlu1 %v312_v35, %s2518_s14 }
 0x152   :  { %722 = vrot.lane.b32.xlu1 %v2652_v34, %s2513_s24 }
 0x1b8   :  { %v472_v37 = vpop.permute.xlu0 %471  ;;  %v318_v38 = vpop.permute.xlu1 %317 }
 0x1bc   :  { %v320_v39 = vpop.permute.xlu1 %319  ;;  %v645_v42 = vpop.permute.xlu0 %644 }
 0x1bd   :  { %v322_v41 = vsel %vm321_vm7, %v318_v38, %v320_v39  ;;  %v646_v46 = vsel %vm53_vm1, %v2587_v5, %v645_v42 }
 0x1be   :  { %2398 = vmatpush3.msra.mxu1 %v322_v41 }
 0x1bf   :  { %2400 = vmatmul.mubr.msk.f32.vlgmr.msra.gmra.mxu1 %vm324_vm6, %v2680_v40  ;;  %2407 = vmatprep.subr.mxu1 %v2512_v0 }
 0x1c0   :  { %v474_v43 = vpop.permute.xlu1 %473  ;;  %2409 = vmatprep.mubr.msk.f32.mxu1 %vm2517_vm4, %v2512_v0  ;;  %v801_v47 = vpop.permute.xlu0 %800 }
 0x1c1   :  { %v476_v45 = vsel %vm475_vm8, %v472_v37, %v474_v43  ;;  %v802_v50 = vsel %vm222_vm3, %v2611_v13, %v801_v47 }
 0x1c2   :  { %2408 = vmatpush3.msra.mxu1 %v476_v45 }
 0x1c3   :  { %2410 = vmatmul.mubr.msk.f32.vlgmr.msra.gmra.mxu1 %vm324_vm6, %v2691_v44  ;;  %2318 = vmatprep.subr.msk.mxu1 %vm59_vm0, %v645_v42 }
 0x1c4   :  { %2319 = vmatpush1.msk.msra.mxu1 %vm59_vm0, %v646_v46  ;;  %v723_v48 = vpop.permute.xlu1 %722  ;;  %715 = vmatprep.mubr.f32.mxu1 %v2512_v0 }
 0x1c5   :  { %v724_v49 = vsel %vm55_vm2, %v2585_v4, %v723_v48  ;;  %2321 = vmatprep.subr.msk.mxu0 %vm59_vm0, %v723_v48  ;;  %2324 = vmatprep.subr.msk.mxu1 %vm59_vm0, %v801_v47 }
 0x1c6   :  { %2322 = vmatpush1.msk.msra.mxu0 %vm59_vm0, %v724_v49 }
 0x1c7   :  { %2320 = vmatmul.mubr.msk.f32.vlgmr.msra.gmra.mxu1 %vm55_vm2, %v2592_v8  ;;  %2323 = vmatmul.mubr.msk.f32.vlgmr.msra.gmra.mxu0 %vm55_vm2, %v2597_v9 }
 0x1c8   :  { %2325 = vmatpush1.msk.msra.mxu1 %vm59_vm0, %v802_v50  ;;  %871 = vmatprep.mubr.f32.mxu1 %v2512_v0 }
 0x1c9   :  { %2422 = vmatprep.subr.mxu1 %v2512_v0  ;;  %2417 = vmatprep.subr.mxu0 %v2512_v0 }
 0x1ca   :  { %2419 = vmatprep.mubr.msk.f32.mxu0 %vm2517_vm4, %v2512_v0 }
 0x1cb   :  { %2326 = vmatmul.mubr.msk.f32.vlgmr.msra.gmra.mxu1 %vm55_vm2, %v2617_v14 }
 0x1cc   :  { %2424 = vmatprep.mubr.msk.f32.mxu1 %vm2517_vm4, %v2512_v0 }
 0x207   :  { %v467_v51 = vpop.f32.mrf.mxu0 }
 0x209   :  { %v2406_v52 = vpop.f32.mrf.mxu0 }
 0x20b   :  { %v2722_v53 = vpop.f32.mrf.mxu0 }
 0x20d   :  { %v2416_v54 = vpop.f32.mrf.mxu0 }
 0x27f   :  { %v394_v55 = vpop.f32.mrf.mxu1 }
 0x280   :  { %v468_v57 = vadd.f32 %v467_v51, %v394_v55 }
 0x281   :  { %v2401_v56 = vpop.f32.mrf.mxu1 }
 0x283   :  { %v547_v58 = vpop.f32.mrf.mxu1 }
 0x284   :  { %v2724_v59 = vadd.f32 %v547_v58, %v468_v57 }
 0x285   :  { %v2411_v60 = vpop.f32.mrf.mxu1 }
 0x287   :  { %v717_v61 = vpop.f32.mrf.mxu1  ;;  %v795_v62 = vpop.f32.mrf.mxu0 }
 0x288   :  { %v796_v2 = vadd.f32 %v795_v62, %v717_v61 }
 0x289   :  { %v719_v63 = vpop.f32.mrf.mxu1  ;;  %v797_v1 = vpop.f32.mrf.mxu0 }
 0x28a   :  { %v798_v6 = vadd.f32 %v797_v1, %v719_v63 }
 0x28b   :  { %v873_v3 = vpop.f32.mrf.mxu1 }
 0x28c   :  { %v878_v7 = vadd.f32 %v873_v3, %v796_v2  ;;  %v2818_v2 = vld [vmem:[%s2903_s0 + $0xc] sm:$0xf] }
 0x28d   :  { %v875_v10 = vpop.f32.mrf.mxu1 }
 0x28e   :  { %v880_v11 = vadd.f32 %v878_v7, %v2627_v23  ;;  %v879_v12 = vadd.f32 %v875_v10, %v798_v6 }
 0x290   :  { %v882_v15 = vmax.f32 %v880_v11, 0.0  ;;  %v881_v16 = vadd.f32 %v879_v12, %v2627_v23 }
 0x292   :  { %v883_v17 = vmax.f32 %v881_v16, 0.0  ;;  %2423 = vmatpush3.msk.msra.mxu1 %vm44_vm5, %v882_v15  ;;  %v884_v18 = vsel %vm44_vm5, %v882_v15, 0.0 }
 0x293   :  { %888 = vrot.lane.b32.xlu1 %v884_v18, %s2519_s15  ;;  %2425 = vmatmul.mubr.msk.f32.vlgmr.msra.gmra.mxu1 %vm324_vm6, %v2641_v32 }
 0x294   :  { %890 = vrot.lane.b32.xlu0 %v883_v17, %s2519_s15  ;;  %2432 = vmatprep.subr.mxu1 %v2512_v0 }
 0x295   :  { %2433 = vmatpush3.msk.msra.mxu1 %vm59_vm0, %v2652_v34  ;;  %2434 = vmatprep.mubr.msk.f32.mxu1 %vm2517_vm4, %v2512_v0 }
 0x297   :  { %1034 = vrot.lane.b32.xlu1 %v884_v18, %s2518_s14  ;;  %2435 = vmatmul.mubr.msk.f32.vlgmr.msra.gmra.mxu1 %vm55_vm2, %v2664_v36 }
 0x298   :  { %1036 = vrot.lane.b32.xlu0 %v883_v17, %s2518_s14  ;;  %1340 = vmatprep.mubr.f32.mxu1 %v2512_v0 }
 0x29b   :  { %1191 = vrot.lane.b32.xlu1 %v2748_v19, %s2514_s25 }
 0x29c   :  { %1269 = vrot.lane.b32.xlu0 %v2748_v19, %s2513_s24 }
 0x29f   :  { %1347 = vrot.lane.b32.xlu1 %v2748_v19, %s2516_s28 }
 0x305   :  { %v889_v20 = vpop.permute.xlu1 %888 }
 0x306   :  { %v891_v21 = vpop.permute.xlu0 %890 }
 0x307   :  { %v892_v22 = vsel %vm321_vm7, %v889_v20, %v891_v21 }
 0x308   :  { %2418 = vmatpush3.msra.mxu0 %v892_v22 }
 0x309   :  { %2420 = vmatmul.mubr.msk.f32.vlgmr.msra.gmra.mxu0 %vm324_vm6, %v2680_v40  ;;  %v1035_v25 = vpop.permute.xlu1 %1034  ;;  %2427 = vmatprep.subr.mxu0 %v2512_v0 }
 0x30a   :  { %v1037_v26 = vpop.permute.xlu0 %1036  ;;  %2429 = vmatprep.mubr.msk.f32.mxu0 %vm2517_vm4, %v2512_v0 }
 0x30b   :  { %v1038_v27 = vsel %vm475_vm8, %v1035_v25, %v1037_v26 }
 0x30c   :  { %2428 = vmatpush3.msra.mxu0 %v1038_v27 }
 0x30d   :  { %2430 = vmatmul.mubr.msk.f32.vlgmr.msra.gmra.mxu0 %vm324_vm6, %v2691_v44  ;;  %v1192_v28 = vpop.permute.xlu1 %1191 }
 0x30e   :  { %v1193_v29 = vsel %vm53_vm1, %v2587_v5, %v1192_v28  ;;  %v1270_v30 = vpop.permute.xlu0 %1269  ;;  %2334 = vmatprep.subr.msk.mxu0 %vm59_vm0, %v1192_v28  ;;  %1262 = vmatprep.mubr.f32.mxu0 %v2512_v0 }
 0x30f   :  { %v1271_v31 = vsel %vm55_vm2, %v2585_v4, %v1270_v30  ;;  %2335 = vmatpush1.msk.msra.mxu0 %vm59_vm0, %v1193_v29  ;;  %2337 = vmatprep.subr.msk.mxu1 %vm59_vm0, %v1270_v30 }
 0x310   :  { %2338 = vmatpush1.msk.msra.mxu1 %vm59_vm0, %v1271_v31 }
 0x311   :  { %2336 = vmatmul.mubr.msk.f32.vlgmr.msra.gmra.mxu0 %vm55_vm2, %v2592_v8  ;;  %2339 = vmatmul.mubr.msk.f32.vlgmr.msra.gmra.mxu1 %vm55_vm2, %v2597_v9  ;;  %v1348_v33 = vpop.permute.xlu1 %1347 }
 0x312   :  { %v1349_v34 = vsel %vm222_vm3, %v2611_v13, %v1348_v33  ;;  %2340 = vmatprep.subr.msk.mxu0 %vm59_vm0, %v1348_v33  ;;  %1418 = vmatprep.mubr.f32.mxu0 %v2512_v0 }
 0x313   :  { %2341 = vmatpush1.msk.msra.mxu0 %vm59_vm0, %v1349_v34  ;;  %2437 = vmatprep.subr.mxu1 %v2512_v0 }
 0x314   :  { %2442 = vmatprep.subr.mxu0 %v2512_v0  ;;  %2439 = vmatprep.mubr.msk.f32.mxu1 %vm2517_vm4, %v2512_v0 }
 0x315   :  { %2342 = vmatmul.mubr.msk.f32.vlgmr.msra.gmra.mxu0 %vm55_vm2, %v2617_v14 }
 0x316   :  { %2444 = vmatprep.mubr.msk.f32.mxu0 %vm2517_vm4, %v2512_v0 }
 0x353   :  { %v1030_v35 = vpop.f32.mrf.mxu1 }
 0x355   :  { %v2426_v37 = vpop.f32.mrf.mxu1 }
 0x357   :  { %v2792_v38 = vpop.f32.mrf.mxu1 }
 0x359   :  { %v2436_v39 = vpop.f32.mrf.mxu1 }
 0x3c9   :  { %v960_v41 = vpop.f32.mrf.mxu0 }
 0x3ca   :  { %v1031_v43 = vadd.f32 %v1030_v35, %v960_v41 }
 0x3cb   :  { %v2421_v42 = vpop.f32.mrf.mxu0 }
 0x3cd   :  { %v1106_v45 = vpop.f32.mrf.mxu0 }
 0x3ce   :  { %v2794_v46 = vadd.f32 %v1106_v45, %v1031_v43 }
 0x3cf   :  { %v2431_v47 = vpop.f32.mrf.mxu0 }
 0x3d1   :  { %v1264_v48 = vpop.f32.mrf.mxu0  ;;  %v1342_v49 = vpop.f32.mrf.mxu1 }
 0x3d2   :  { %v1343_v52 = vadd.f32 %v1342_v49, %v1264_v48 }
 0x3d3   :  { %v1266_v50 = vpop.f32.mrf.mxu0  ;;  %v1344_v51 = vpop.f32.mrf.mxu1 }
 0x3d4   :  { %v1345_v55 = vadd.f32 %v1344_v51, %v1266_v50 }
 0x3d5   :  { %v1420_v54 = vpop.f32.mrf.mxu0 }
 0x3d6   :  { %v1425_v56 = vadd.f32 %v1420_v54, %v1343_v52 }
 0x3d7   :  { %v1422_v57 = vpop.f32.mrf.mxu0 }
 0x3d8   :  { %v1427_v58 = vadd.f32 %v1425_v56, %v2627_v23  ;;  %v1426_v60 = vadd.f32 %v1422_v57, %v1345_v55 }
 0x3da   :  { %v1429_v61 = vmax.f32 %v1427_v58, 0.0  ;;  %v1428_v62 = vadd.f32 %v1426_v60, %v2627_v23 }
 0x3dc   :  { %v1430_v63 = vmax.f32 %v1428_v62, 0.0  ;;  %2443 = vmatpush3.msk.msra.mxu0 %vm44_vm5, %v1429_v61  ;;  %v1431_v1 = vsel %vm44_vm5, %v1429_v61, 0.0 }
 0x3dd   :  { %1435 = vrot.lane.b32.xlu0 %v1431_v1, %s2519_s15  ;;  %2445 = vmatmul.mubr.msk.f32.vlgmr.msra.gmra.mxu0 %vm324_vm6, %v2641_v32 }
 0x3de   :  { %1437 = vrot.lane.b32.xlu1 %v1430_v63, %s2519_s15  ;;  %2452 = vmatprep.subr.mxu0 %v2512_v0 }
 0x3df   :  { %2453 = vmatpush3.msk.msra.mxu0 %vm59_vm0, %v2748_v19  ;;  %2454 = vmatprep.mubr.msk.f32.mxu0 %vm2517_vm4, %v2512_v0 }
 0x3e1   :  { %1581 = vrot.lane.b32.xlu0 %v1431_v1, %s2518_s14  ;;  %2455 = vmatmul.mubr.msk.f32.vlgmr.msra.gmra.mxu0 %vm55_vm2, %v2664_v36 }
 0x3e2   :  { %1583 = vrot.lane.b32.xlu1 %v1430_v63, %s2518_s14  ;;  %1887 = vmatprep.mubr.f32.mxu0 %v2512_v0 }
 0x3e5   :  { %1738 = vrot.lane.b32.xlu0 %v2818_v2, %s2514_s25 }
 0x3e6   :  { %1816 = vrot.lane.b32.xlu1 %v2818_v2, %s2513_s24 }
 0x3e9   :  { %1894 = vrot.lane.b32.xlu0 %v2818_v2, %s2516_s28 }
 0x44f   :  { %v1436_v3 = vpop.permute.xlu0 %1435 }
 0x450   :  { %v1438_v6 = vpop.permute.xlu1 %1437 }
 0x451   :  { %v1439_v7 = vsel %vm321_vm7, %v1436_v3, %v1438_v6 }
 0x452   :  { %2438 = vmatpush3.msra.mxu1 %v1439_v7 }
 0x453   :  { %v1582_v10 = vpop.permute.xlu0 %1581  ;;  %2440 = vmatmul.mubr.msk.f32.vlgmr.msra.gmra.mxu1 %vm324_vm6, %v2680_v40  ;;  %2447 = vmatprep.subr.mxu1 %v2512_v0 }
 0x454   :  { %v1584_v11 = vpop.permute.xlu1 %1583  ;;  %2449 = vmatprep.mubr.msk.f32.mxu1 %vm2517_vm4, %v2512_v0 }
 0x455   :  { %v1585_v12 = vsel %vm475_vm8, %v1582_v10, %v1584_v11 }
 0x456   :  { %2448 = vmatpush3.msra.mxu1 %v1585_v12 }
 0x457   :  { %v1739_v15 = vpop.permute.xlu0 %1738  ;;  %2450 = vmatmul.mubr.msk.f32.vlgmr.msra.gmra.mxu1 %vm324_vm6, %v2691_v44 }
 0x458   :  { %v1740_v16 = vsel %vm53_vm1, %v2587_v5, %v1739_v15  ;;  %2350 = vmatprep.subr.msk.mxu1 %vm59_vm0, %v1739_v15  ;;  %v1817_v17 = vpop.permute.xlu1 %1816  ;;  %1809 = vmatprep.mubr.f32.mxu1 %v2512_v0 }
 0x459   :  { %v1818_v18 = vsel %vm55_vm2, %v2585_v4, %v1817_v17  ;;  %2351 = vmatpush1.msk.msra.mxu1 %vm59_vm0, %v1740_v16  ;;  %2353 = vmatprep.subr.msk.mxu0 %vm59_vm0, %v1817_v17 }
 0x45a   :  { %2354 = vmatpush1.msk.msra.mxu0 %vm59_vm0, %v1818_v18 }
 0x45b   :  { %v1895_v19 = vpop.permute.xlu0 %1894  ;;  %2352 = vmatmul.mubr.msk.f32.vlgmr.msra.gmra.mxu1 %vm55_vm2, %v2592_v8  ;;  %2355 = vmatmul.mubr.msk.f32.vlgmr.msra.gmra.mxu0 %vm55_vm2, %v2597_v9 }
 0x45c   :  { %v1896_v5 = vsel %vm222_vm3, %v2611_v13, %v1895_v19  ;;  %2356 = vmatprep.subr.msk.mxu1 %vm59_vm0, %v1895_v19  ;;  %1965 = vmatprep.mubr.f32.mxu1 %v2512_v0 }
 0x45d   :  { %2357 = vmatpush1.msk.msra.mxu1 %vm59_vm0, %v1896_v5  ;;  %2457 = vmatprep.subr.mxu0 %v2512_v0 }
 0x45e   :  { %2462 = vmatprep.subr.mxu1 %v2512_v0  ;;  %2459 = vmatprep.mubr.msk.f32.mxu0 %vm2517_vm4, %v2512_v0 }
 0x45f   :  { %2358 = vmatmul.mubr.msk.f32.vlgmr.msra.gmra.mxu1 %vm55_vm2, %v2617_v14 }
 0x460   :  { %2464 = vmatprep.mubr.msk.f32.mxu1 %vm2517_vm4, %v2512_v0 }
 0x49d   :  { %v1577_v4 = vpop.f32.mrf.mxu0 }
 0x49f   :  { %v2446_v8 = vpop.f32.mrf.mxu0 }
 0x4a1   :  { %v1728_v9 = vpop.f32.mrf.mxu0 }
 0x4a3   :  { %v2456_v13 = vpop.f32.mrf.mxu0 }
 0x513   :  { %v1507_v20 = vpop.f32.mrf.mxu1 }
 0x514   :  { %v1578_v22 = vadd.f32 %v1577_v4, %v1507_v20 }
 0x515   :  { %v2441_v21 = vpop.f32.mrf.mxu1 }
 0x517   :  { %v1653_v25 = vpop.f32.mrf.mxu1 }
 0x518   :  { %v1657_v26 = vadd.f32 %v1653_v25, %v1578_v22 }
 0x519   :  { %v2451_v27 = vpop.f32.mrf.mxu1 }
 0x51b   :  { %v1811_v28 = vpop.f32.mrf.mxu1  ;;  %v1889_v29 = vpop.f32.mrf.mxu0 }
 0x51c   :  { %v1890_v33 = vadd.f32 %v1889_v29, %v1811_v28 }
 0x51d   :  { %v1813_v30 = vpop.f32.mrf.mxu1  ;;  %v1891_v31 = vpop.f32.mrf.mxu0 }
 0x51e   :  { %v1892_v14 = vadd.f32 %v1891_v31, %v1813_v30 }
 0x51f   :  { %v1967_v34 = vpop.f32.mrf.mxu1 }
 0x520   :  { %v1972_v35 = vadd.f32 %v1967_v34, %v1890_v33 }
 0x521   :  { %v1969_v37 = vpop.f32.mrf.mxu1 }
 0x522   :  { %v1974_v39 = vadd.f32 %v1972_v35, %v2627_v23  ;;  %v1973_v41 = vadd.f32 %v1969_v37, %v1892_v14 }
 0x524   :  { %v1976_v42 = vmax.f32 %v1974_v39, 0.0  ;;  %v1975_v43 = vadd.f32 %v1973_v41, %v2627_v23  ;;  %v38_v23 = vld [vmem:[%s2907_s4] sm:$0xff]  ;;  %s2520_s4 = smov [#allocation2]  }
 0x525   :  { %s2287_s6 = sshll.u32 %s2520_s4, 4  ;;  %s2288_s6 = int_to_ptr.vmem [resolvable:$true] %s2287_s6 }
 0x526   :  { %v1977_v45 = vmax.f32 %v1975_v43, 0.0  ;;  %2463 = vmatpush3.msk.msra.mxu1 %vm44_vm5, %v1976_v42  ;;  %v1978_v47 = vsel %vm44_vm5, %v1976_v42, 0.0  ;;  %s2490_s29 = scalar_lea.vmem %s2288_s6, 512  ;;  %p2495_p1 = scmp.lt.s32.totalorder %s2288_s6, %s2288_s6 }
 0x527   :  { %2465 = vmatmul.mubr.msk.f32.vlgmr.msra.gmra.mxu1 %vm324_vm6, %v2641_v32  ;;  %1982 = vrot.lane.b32.xlu1 %v1978_v47, %s2519_s15  ;;  %p2491_p0 = scmp.ne.s32.totalorder %s2288_s6, %s2490_s29  ;;  %p2496_p2 = scmp.lt.s32.totalorder %s2490_s29, %s2490_s29 }
 0x528   :  { %1984 = vrot.lane.b32.xlu0 %v1977_v45, %s2519_s15  ;;  %2472 = vmatprep.subr.mxu1 %v2512_v0 }
 0x529   :  { %2473 = vmatpush3.msk.msra.mxu1 %vm59_vm0, %v2818_v2  ;;  %2474 = vmatprep.mubr.msk.f32.mxu1 %vm2517_vm4, %v2512_v0  ;;  %p2497_p3 = por %p2496_p2, %p2495_p1 }
 0x52b   :  { %2475 = vmatmul.mubr.msk.f32.vlgmr.msra.gmra.mxu1 %vm55_vm2, %v2664_v36  ;;  %2128 = vrot.lane.b32.xlu1 %v1978_v47, %s2518_s14  ;;  %p2498_p4 = pnand %p2497_p3, %p2491_p0 }
 0x52c   :  { %2130 = vrot.lane.b32.xlu0 %v1977_v45, %s2518_s14 }
 0x52f   :  { %554 = vperm.xlu1 %2489, %v38_v23  }
 0x530   :  { %561 = vperm.xlu0 %2488, %v40_v24  }
 0x599   :  { %v1983_v32 = vpop.permute.xlu1 %1982 }
 0x59a   :  { %v1985_v48 = vpop.permute.xlu0 %1984 }
 0x59b   :  { %v1986_v49 = vsel %vm321_vm7, %v1983_v32, %v1985_v48 }
 0x59c   :  { %2458 = vmatpush3.msra.mxu0 %v1986_v49 }
 0x59d   :  { %2460 = vmatmul.mubr.msk.f32.vlgmr.msra.gmra.mxu0 %vm324_vm6, %v2680_v40  ;;  %v2129_v36 = vpop.permute.xlu1 %2128  ;;  %2467 = vmatprep.subr.mxu0 %v2512_v0 }
 0x59e   :  { %v2131_v50 = vpop.permute.xlu0 %2130  ;;  %2469 = vmatprep.mubr.msk.f32.mxu0 %vm2517_vm4, %v2512_v0 }
 0x59f   :  { %v2132_v51 = vsel %vm475_vm8, %v2129_v36, %v2131_v50 }
 0x5a0   :  { %2468 = vmatpush3.msra.mxu0 %v2132_v51 }
 0x5a1   :  { %2470 = vmatmul.mubr.msk.f32.vlgmr.msra.gmra.mxu0 %vm324_vm6, %v2691_v44 }
 0x5aa   :  { %v555_v52 = vpop.permute.xlu1 %554 }
 0x5ab   :  { %v557_v54 = vadd.f32 %v555_v52, %v2724_v59  ;;  %v1111_v55 = vadd.f32 %v2794_v46, %v555_v52  ;;  %v1658_v56 = vadd.f32 %v1657_v26, %v555_v52  ;;  %v562_v40 = vpop.permute.xlu0 %561 }
 0x5ac   :  { %v636_v57 = vadd.f32 %v2722_v53, %v562_v40  ;;  %v1182_v58 = vadd.f32 %v2792_v38, %v562_v40  ;;  %v1729_v60 = vadd.f32 %v1728_v9, %v562_v40 }
 0x5ad   :  { %v558_v61 = vmax.f32 %v557_v54, 0.0  ;;  %v1112_v0 = vmax.f32 %v1111_v55, 0.0  ;;  %v1659_v62 = vmax.f32 %v1658_v56, 0.0 }
 0x5af   :  { %v639_v63 = vadd.f32 %v636_v57, %v558_v61  ;;  %v1185_v1 = vadd.f32 %v1182_v58, %v1112_v0  ;;  %v1732_v2 = vadd.f32 %v1729_v60, %v1659_v62 }
 0x5b1   :  { %640 = vst [vmem:[#allocation2] sm:$0xff] %v639_v63  ;;  %1187 = vst [vmem:[#allocation2 + $0x8] sm:$0xff] %v1185_v1 }
 0x5b2   :  { %1734 = vst [vmem:[#allocation2 + $0x10] sm:$0xff] %v1732_v2 }
 0x5e7   :  { %v2124_v44 = vpop.f32.mrf.mxu1 }
 0x5e9   :  { %v2466_v59 = vpop.f32.mrf.mxu1 }
 0x5eb   :  { %v2275_v3 = vpop.f32.mrf.mxu1 }
 0x5ec   :  { %v2276_v46 = vadd.f32 %v2275_v3, %v562_v40 }
 0x5ed   :  { %v2476_v6 = vpop.f32.mrf.mxu1 }
 0x65d   :  { %v2054_v7 = vpop.f32.mrf.mxu0 }
 0x65e   :  { %v2125_v53 = vadd.f32 %v2124_v44, %v2054_v7 }
 0x65f   :  { %v2461_v10 = vpop.f32.mrf.mxu0 }
 0x661   :  { %v2200_v11 = vpop.f32.mrf.mxu0 }
 0x662   :  { %v2204_v38 = vadd.f32 %v2200_v11, %v2125_v53 }
 0x663   :  { %v2471_v12 = vpop.f32.mrf.mxu0 }
 0x664   :  { %v2205_v15 = vadd.f32 %v2204_v38, %v555_v52 }
 0x666   :  { %v2206_v16 = vmax.f32 %v2205_v15, 0.0 }
 0x668   :  { %v2279_v17 = vadd.f32 %v2276_v46, %v2206_v16 }
 0x66a   :  { %2281 = vst [vmem:[#allocation2 + $0x18] sm:$0xff] %v2279_v17 }
 0x66b   :  { %2501 = shalt.err (!%p2498_p4)
}
 0x66c   :  { %s2521_s30 = smov 128   ;;  %s2522_s8 = smov 8  }
 0x66d   :  { %2293 = dma.vmem_to_hbm [thread:$0]  %s2288_s6, 512, %s2910_s7, [#allocation3], %s2521_s30, %s2521_s30, %s2522_s8  }
 0x66e   :  { %2510 = dma.done.wait [#allocation3], 512  }
 0x66f   :  { %2511 = vsyncadd [#allocation3], 4294966784 }
 0x670   :  { %2297 = vsyncpa [#allocation3], 1 }

</bundles_post_ra>
